<compile_context>
chip_gen: v6e
topology: v6e:2x2x1
jax: 0.10.0
libtpu: 0.0.40
codegen_flags: <defaults>
</compile_context>

<pallas_src>
import functools

import jax
import jax.numpy as jnp
from jax.experimental import pallas as pl
from jax.experimental.pallas import tpu as pltpu

LANE = 128      # f32 lane width
SUBLANE = 8     # f32 sublane count


def _round_up(x, m):
    return ((x + m - 1) // m) * m


def _fused_mlp_kernel(x_ref, *refs, num_linear):
    """Fused (Linear+ReLU)*L-1 -> Linear on one batch tile.

    refs = (w0, b0, w1, b1, ..., w_{L-1}, b_{L-1}, o_ref).
    Intermediate activations stay in VMEM/vregs; only the final tile is stored.
    """
    o_ref = refs[-1]
    h = x_ref[...]
    for li in range(num_linear):
        w = refs[2 * li][...]
        b = refs[2 * li + 1][...]          # (1, N) broadcasts over batch rows
        h = jnp.dot(h, w, preferred_element_type=jnp.float32) + b
        if li < num_linear - 1:
            h = jnp.maximum(h, 0.0)
    o_ref[...] = h.astype(o_ref.dtype)


def fused_mlp_pallas(x, wb_list, *, tb):
    """x: (Bp, Kp) f32; wb_list: [(Kp_i, Np_i) w, (1, Np_i) b]; all dims padded.

    Returns (Bp, Np_last) f32.
    """
    B, K = x.shape
    num_linear = len(wb_list)
    n_out = wb_list[-1][0].shape[1]
    assert B % tb == 0 and K % LANE == 0 and n_out % LANE == 0

    in_specs = [pl.BlockSpec((tb, K), lambda i: (i, 0))]
    flat_args = []
    flops = 0
    bytes_accessed = 4 * (B * K + B * n_out)
    for (w, b) in wb_list:
        kin, nout = w.shape
        # Weights/bias as full blocks with a constant index -> loaded once,
        # kept VMEM-resident across the batch grid.
        in_specs.append(pl.BlockSpec((kin, nout), lambda i: (0, 0)))
        in_specs.append(pl.BlockSpec((1, nout), lambda i: (0, 0)))
        flat_args += [w, b]
        flops += 2 * B * kin * nout
        bytes_accessed += 4 * (kin * nout + nout)

    kernel = functools.partial(_fused_mlp_kernel, num_linear=num_linear)
    return pl.pallas_call(
        kernel,
        out_shape=jax.ShapeDtypeStruct((B, n_out), jnp.float32),
        grid=(B // tb,),
        in_specs=in_specs,
        out_specs=pl.BlockSpec((tb, n_out), lambda i: (i, 0)),
        compiler_params=pltpu.CompilerParams(
            dimension_semantics=("parallel",),   # shard batch tiles over v7x TCs
        ),
        cost_estimate=pl.CostEstimate(
            flops=flops, transcendentals=0, bytes_accessed=bytes_accessed),
    )(x, *flat_args)


def _max_tb_for_vmem(k_pad, wb_list, n_out_pad, budget_bytes=24 << 20):
    """Largest batch tile whose fused working set fits a conservative VMEM
    budget (safe under v7x's 32 MiB scoped default / 64 MiB physical)."""
    weight_bytes = 2 * sum((w.size + b.size) * 4 for w, b in wb_list)
    tb = 256
    while tb > SUBLANE:
        act_bytes = 2 * (tb * k_pad + tb * n_out_pad) * 4  # dbl-buffered x / out
        if weight_bytes + act_bytes <= budget_bytes:
            return tb
        tb //= 2
    return SUBLANE


def init_params(key, input_size, num_layers, num_neurons, out_size=10):
    """Deterministic PyTorch-style Linear init: U(-1/sqrt(fan_in), 1/sqrt(fan_in))."""
    params = []
    fan_in = input_size
    dims = [num_neurons] * num_layers + [out_size]
    for out_dim in dims:
        key, kw, kb = jax.random.split(key, 3)
        bound = 1.0 / jnp.sqrt(jnp.float32(fan_in))
        # stored as (in, out) == torch weight (out, in) transposed
        w = jax.random.uniform(kw, (fan_in, out_dim), jnp.float32, -bound, bound)
        b = jax.random.uniform(kb, (1, out_dim), jnp.float32, -bound, bound)
        params.append((w, b))
        fan_in = out_dim
    return params


def simple_nn_forward(x_nchw, params):
    """Flatten -> (Linear+ReLU)*num_layers -> Linear(., 10), fused in one kernel."""
    B = x_nchw.shape[0]
    x = x_nchw.reshape(B, -1).astype(jnp.float32)  # nn.Flatten()
    K = x.shape[1]
    n_out = params[-1][0].shape[1]

    # Zero-pad every feature dim up to a lane multiple (lane-dense MXU/vst).
    padded = []
    for w, b in params:
        kin, nout = w.shape
        kp, nop = _round_up(kin, LANE), _round_up(nout, LANE)
        wp = jnp.zeros((kp, nop), jnp.float32).at[:kin, :nout].set(w)
        bp = jnp.zeros((1, nop), jnp.float32).at[:, :nout].set(b)
        padded.append((wp, bp))
    k_pad = padded[0][0].shape[0]
    n_out_pad = padded[-1][0].shape[1]

    # Batch tile: bounded by the VMEM budget, at least a full sublane group.
    tb = min(_max_tb_for_vmem(k_pad, padded, n_out_pad), _round_up(B, SUBLANE))
    b_pad = _round_up(B, tb)
    xp = jnp.zeros((b_pad, k_pad), jnp.float32).at[:B, :K].set(x)

    out_p = fused_mlp_pallas(xp, padded, tb=tb)
    return out_p[:B, :n_out]


if __name__ == "__main__":
    # Small, module-consistent shapes: batch=2, channels=4, spatial=16x16
    # => input_size = 4*16*16 = 1024; num_layers=2; num_neurons=32; 10 outputs.
    B, C, H, W = 2, 4, 16, 16
    input_size = C * H * W
    num_layers = 2
    num_neurons = 32

    key = jax.random.PRNGKey(0)
    key, kx = jax.random.split(key)
    x = jax.random.normal(kx, (B, C, H, W), jnp.float32)

    params = init_params(key, input_size, num_layers, num_neurons)

    out = simple_nn_forward(x, params)
    out = jax.block_until_ready(out)
    assert out.shape == (B, 10) and out.dtype == jnp.float32

    # Pure-JAX reference of the original (unpadded) forward pass.
    h_ref = x.reshape(B, -1)
    for li, (w, b) in enumerate(params):
        h_ref = h_ref @ w + b
        if li < len(params) - 1:
            h_ref = jnp.maximum(h_ref, 0.0)
    assert jnp.allclose(out, h_ref, atol=1e-5, rtol=1e-5)

    print("KERNEL_OK")
</pallas_src>

<mosaic_0001>
module attributes {stable_mosaic.version = 11 : i64} {
  func.func @_fused_mlp_kernel(%arg0: i32, %arg1: memref<8x1024xf32, #tpu.memory_space<vmem>>, %arg2: memref<1024x128xf32, #tpu.memory_space<vmem>>, %arg3: memref<1x128xf32, #tpu.memory_space<vmem>>, %arg4: memref<128x128xf32, #tpu.memory_space<vmem>>, %arg5: memref<1x128xf32, #tpu.memory_space<vmem>>, %arg6: memref<128x128xf32, #tpu.memory_space<vmem>>, %arg7: memref<1x128xf32, #tpu.memory_space<vmem>>, %arg8: memref<8x128xf32, #tpu.memory_space<vmem>>) attributes {dimension_semantics = [#tpu.dimension_semantics<parallel>], iteration_bounds = array<i64: 1>, scalar_prefetch = 0 : i64, scratch_operands = 0 : i64, tpu.core_type = #tpu.core_type<tc>, window_params = [{transform_indices = @transform_0, window_bounds = array<i64: 8, 1024>}, {pipeline_mode = #tpu.pipeline_mode<synchronous>, transform_indices = @transform_1, window_bounds = array<i64: 1024, 128>}, {pipeline_mode = #tpu.pipeline_mode<synchronous>, transform_indices = @transform_2, window_bounds = array<i64: 1, 128>}, {pipeline_mode = #tpu.pipeline_mode<synchronous>, transform_indices = @transform_3, window_bounds = array<i64: 128, 128>}, {pipeline_mode = #tpu.pipeline_mode<synchronous>, transform_indices = @transform_4, window_bounds = array<i64: 1, 128>}, {pipeline_mode = #tpu.pipeline_mode<synchronous>, transform_indices = @transform_5, window_bounds = array<i64: 128, 128>}, {pipeline_mode = #tpu.pipeline_mode<synchronous>, transform_indices = @transform_6, window_bounds = array<i64: 1, 128>}, {transform_indices = @transform_7, window_bounds = array<i64: 8, 128>}]} {
    %c0 = arith.constant 0 : index
    %c0_0 = arith.constant 0 : index
    %0 = vector.load %arg1[%c0, %c0_0] : memref<8x1024xf32, #tpu.memory_space<vmem>>, vector<8x1024xf32>
    %c0_1 = arith.constant 0 : index
    %c0_2 = arith.constant 0 : index
    %1 = vector.load %arg2[%c0_1, %c0_2] : memref<1024x128xf32, #tpu.memory_space<vmem>>, vector<1024x128xf32>
    %c0_3 = arith.constant 0 : index
    %c0_4 = arith.constant 0 : index
    %2 = vector.load %arg3[%c0_3, %c0_4] : memref<1x128xf32, #tpu.memory_space<vmem>>, vector<1x128xf32>
    %cst = arith.constant dense<0.000000e+00> : vector<8x128xf32>
    %3 = tpu.matmul %0, %1, %cst {dimension_numbers = #tpu.dot_dimension_numbers<[1], [0], [0], [1], [0, 0, 1, 1], [], []>} : vector<8x1024xf32>, vector<1024x128xf32>, vector<8x128xf32> -> vector<8x128xf32>
    %4 = vector.broadcast %2 : vector<1x128xf32> to vector<8x128xf32>
    %5 = arith.addf %3, %4 : vector<8x128xf32>
    %cst_5 = arith.constant 0.000000e+00 : f32
    %6 = vector.broadcast %cst_5 : f32 to vector<8x128xf32>
    %7 = arith.maximumf %5, %6 : vector<8x128xf32>
    %c0_6 = arith.constant 0 : index
    %c0_7 = arith.constant 0 : index
    %8 = vector.load %arg4[%c0_6, %c0_7] : memref<128x128xf32, #tpu.memory_space<vmem>>, vector<128x128xf32>
    %c0_8 = arith.constant 0 : index
    %c0_9 = arith.constant 0 : index
    %9 = vector.load %arg5[%c0_8, %c0_9] : memref<1x128xf32, #tpu.memory_space<vmem>>, vector<1x128xf32>
    %cst_10 = arith.constant dense<0.000000e+00> : vector<8x128xf32>
    %10 = tpu.matmul %7, %8, %cst_10 {dimension_numbers = #tpu.dot_dimension_numbers<[1], [0], [0], [1], [0, 0, 1, 1], [], []>} : vector<8x128xf32>, vector<128x128xf32>, vector<8x128xf32> -> vector<8x128xf32>
    %11 = vector.broadcast %9 : vector<1x128xf32> to vector<8x128xf32>
    %12 = arith.addf %10, %11 : vector<8x128xf32>
    %cst_11 = arith.constant 0.000000e+00 : f32
    %13 = vector.broadcast %cst_11 : f32 to vector<8x128xf32>
    %14 = arith.maximumf %12, %13 : vector<8x128xf32>
    %c0_12 = arith.constant 0 : index
    %c0_13 = arith.constant 0 : index
    %15 = vector.load %arg6[%c0_12, %c0_13] : memref<128x128xf32, #tpu.memory_space<vmem>>, vector<128x128xf32>
    %c0_14 = arith.constant 0 : index
    %c0_15 = arith.constant 0 : index
    %16 = vector.load %arg7[%c0_14, %c0_15] : memref<1x128xf32, #tpu.memory_space<vmem>>, vector<1x128xf32>
    %cst_16 = arith.constant dense<0.000000e+00> : vector<8x128xf32>
    %17 = tpu.matmul %14, %15, %cst_16 {dimension_numbers = #tpu.dot_dimension_numbers<[1], [0], [0], [1], [0, 0, 1, 1], [], []>} : vector<8x128xf32>, vector<128x128xf32>, vector<8x128xf32> -> vector<8x128xf32>
    %18 = vector.broadcast %16 : vector<1x128xf32> to vector<8x128xf32>
    %19 = arith.addf %17, %18 : vector<8x128xf32>
    %c0_17 = arith.constant 0 : index
    %c0_18 = arith.constant 0 : index
    %20 = vector.load %arg8[%c0_17, %c0_18] : memref<8x128xf32, #tpu.memory_space<vmem>>, vector<8x128xf32>
    tpu.vector_store %arg8[%c0_17, %c0_18], %19 {strides = array<i32>} : memref<8x128xf32, #tpu.memory_space<vmem>>, vector<8x128xf32>,
    return
  }
  func.func @transform_0(%arg0: i32) -> (i32, i32) {
    %c0_i32 = arith.constant 0 : i32
    %c0_i32_0 = arith.constant 0 : i32
    return %arg0, %c0_i32 : i32, i32
  }
  func.func @transform_1(%arg0: i32) -> (i32, i32) {
    %c0_i32 = arith.constant 0 : i32
    %c0_i32_0 = arith.constant 0 : i32
    %c0_i32_1 = arith.constant 0 : i32
    return %c0_i32, %c0_i32_0 : i32, i32
  }
  func.func @transform_2(%arg0: i32) -> (i32, i32) {
    %c0_i32 = arith.constant 0 : i32
    %c0_i32_0 = arith.constant 0 : i32
    %c0_i32_1 = arith.constant 0 : i32
    return %c0_i32, %c0_i32_0 : i32, i32
  }
  func.func @transform_3(%arg0: i32) -> (i32, i32) {
    %c0_i32 = arith.constant 0 : i32
    %c0_i32_0 = arith.constant 0 : i32
    %c0_i32_1 = arith.constant 0 : i32
    return %c0_i32, %c0_i32_0 : i32, i32
  }
  func.func @transform_4(%arg0: i32) -> (i32, i32) {
    %c0_i32 = arith.constant 0 : i32
    %c0_i32_0 = arith.constant 0 : i32
    %c0_i32_1 = arith.constant 0 : i32
    return %c0_i32, %c0_i32_0 : i32, i32
  }
  func.func @transform_5(%arg0: i32) -> (i32, i32) {
    %c0_i32 = arith.constant 0 : i32
    %c0_i32_0 = arith.constant 0 : i32
    %c0_i32_1 = arith.constant 0 : i32
    return %c0_i32, %c0_i32_0 : i32, i32
  }
  func.func @transform_6(%arg0: i32) -> (i32, i32) {
    %c0_i32 = arith.constant 0 : i32
    %c0_i32_0 = arith.constant 0 : i32
    %c0_i32_1 = arith.constant 0 : i32
    return %c0_i32, %c0_i32_0 : i32, i32
  }
  func.func @transform_7(%arg0: i32) -> (i32, i32) {
    %c0_i32 = arith.constant 0 : i32
    %c0_i32_0 = arith.constant 0 : i32
    return %arg0, %c0_i32 : i32, i32
  }
}

</mosaic_0001>

<bundles_post_ra>
// kernel: tpu_custom_call.1
= control target key start
LH: loop header
LB: loop body
LE: loop exit
PB: predicated region body
PF: predicated region fallthrough
CT: control target
= control target key end

     0   :  { %12 = vsyncpa [#allocation3], 0  ;;  %s1189_s0 = inlined_call_operand.hbm [shape: f32[8,1024], index: 0, kind: input, shape index: {}]   ;;  %s1190_s1 = inlined_call_operand.hbm [shape: f32[1024,128], index: 1, kind: input, shape index: {}]   ;;  %s1191_s2 = inlined_call_operand.vmem [shape: f32[1,128], index: 2, kind: input, shape index: {}]   ;;  %s1192_s3 = inlined_call_operand.hbm [shape: f32[128,128], index: 3, kind: input, shape index: {}]   ;;  %s1193_s4 = inlined_call_operand.vmem [shape: f32[1,128], index: 4, kind: input, shape index: {}]   ;;  %s1194_s5 = inlined_call_operand.hbm [shape: f32[128,128], index: 5, kind: input, shape index: {}]   ;;  %s1195_s6 = inlined_call_operand.vmem [shape: f32[1,128], index: 6, kind: input, shape index: {}]   ;;  %s1196_s7 = inlined_call_operand.hbm [shape: f32[8,128], index: 7, kind: output, shape index: {}]  }
   0x1   :  { %13 = vsyncpa [#allocation6], 0 }
   0x2   :  { %14 = vsyncpa [#allocation9], 0 }
   0x3   :  { %15 = vsyncpa [#allocation4], 0  ;;  %s1073_s24 = smov [#allocation5]  }
   0x4   :  { %s31_s25 = sshll.u32 %s1073_s24, 4  ;;  %s32_s25 = int_to_ptr.vmem [resolvable:$true] %s31_s25 }
   0x5   :  { %s973_s26 = scalar_lea.vmem %s32_s25, 16384  ;;  %p978_p1 = scmp.lt.s32.totalorder %s32_s25, %s32_s25 }
   0x6   :  { %p974_p0 = scmp.ne.s32.totalorder %s32_s25, %s973_s26  ;;  %p979_p2 = scmp.lt.s32.totalorder %s973_s26, %s973_s26 }
   0x8   :  { %p980_p3 = por %p979_p2, %p978_p1 }
   0xa   :  { %p981_p4 = pnand %p980_p3, %p974_p0 }
   0xc   :  { %984 = shalt.err (!%p981_p4)
}
   0xd   :  { %s1074_s27 = smov 128   ;;  %s1075_s28 = smov 8  }
   0xe   :  { %37 = dma.hbm_to_vmem [thread:$0]  %s1190_s1, 16384, %s32_s25, [#allocation6], %s1074_s27, %s1074_s27, %s1075_s28  }
   0xf   :  { %s1076_s8 = smov [#allocation2]   ;;  %s1077_s10 = smov [#allocation7]  }
  0x10   :  { %s22_s9 = sshll.u32 %s1076_s8, 4  ;;  %s45_s11 = sshll.u32 %s1077_s10, 4  ;;  %s23_s9 = int_to_ptr.vmem [resolvable:$true] %s22_s9  ;;  %s46_s11 = int_to_ptr.vmem [resolvable:$true] %s45_s11 }
  0x11   :  { %s993_s12 = scalar_lea.vmem %s23_s9, 1024  ;;  %p998_p6 = scmp.lt.s32.totalorder %s23_s9, %s23_s9 }
  0x12   :  { %p994_p5 = scmp.ne.s32.totalorder %s23_s9, %s993_s12  ;;  %p999_p7 = scmp.lt.s32.totalorder %s993_s12, %s993_s12 }
  0x14   :  { %p1000_p8 = por %p999_p7, %p998_p6 }
  0x16   :  { %p1001_p9 = pnand %p1000_p8, %p994_p5 }
  0x18   :  { %1004 = shalt.err (!%p1001_p9)
}
  0x19   :  { %25 = dma.hbm_to_vmem [thread:$0]  %s1189_s0, 1024, %s23_s9, [#allocation3]  }
  0x1a   :  { %s1013_s15 = scalar_lea.vmem %s46_s11, 2048  ;;  %p1018_p11 = scmp.lt.s32.totalorder %s46_s11, %s46_s11 }
  0x1b   :  { %p1014_p10 = scmp.ne.s32.totalorder %s46_s11, %s1013_s15  ;;  %p1019_p12 = scmp.lt.s32.totalorder %s1013_s15, %s1013_s15 }
  0x1d   :  { %p1020_p13 = por %p1019_p12, %p1018_p11 }
  0x1f   :  { %p1021_p0 = pnand %p1020_p13, %p1014_p10 }
  0x21   :  { %1024 = shalt.err (!%p1021_p0)
}
  0x22   :  { %51 = dma.hbm_to_vmem [thread:$0]  %s1192_s3, 2048, %s46_s11, [#allocation6], %s1074_s27, %s1074_s27, %s1075_s28  }
  0x23   :  { %s1078_s17 = smov [#allocation8]  }
  0x24   :  { %s59_s18 = sshll.u32 %s1078_s17, 4  ;;  %s60_s18 = int_to_ptr.vmem [resolvable:$true] %s59_s18 }
  0x25   :  { %s1033_s19 = scalar_lea.vmem %s60_s18, 2048  ;;  %p1038_p2 = scmp.lt.s32.totalorder %s60_s18, %s60_s18 }
  0x26   :  { %p1034_p1 = scmp.ne.s32.totalorder %s60_s18, %s1033_s19  ;;  %p1039_p3 = scmp.lt.s32.totalorder %s1033_s19, %s1033_s19 }
  0x28   :  { %p1040_p4 = por %p1039_p3, %p1038_p2 }
  0x2a   :  { %p1041_p5 = pnand %p1040_p4, %p1034_p1 }
  0x2c   :  { %1044 = shalt.err (!%p1041_p5)
}
  0x2d   :  { %65 = dma.hbm_to_vmem [thread:$0]  %s1194_s5, 2048, %s60_s18, [#allocation9], %s1074_s27, %s1074_s27, %s1075_s28  }
  0x2e   :  { %1065 = dma.done.wait [#allocation3], 1024  }
  0x2f   :  { %1066 = vsyncadd [#allocation3], 4294966272 }
  0x30   :  { %1067 = dma.done.wait [#allocation6], 18432  }
  0x31   :  { %1068 = vsyncadd [#allocation6], 4294948864 }
  0x32   :  { %1069 = dma.done.wait [#allocation9], 2048  }
  0x33   :  { %1070 = vsyncadd [#allocation9], 4294965248  ;;  %v119_v0 = vld [vmem:[#allocation5 + $0xf8] sm:$0xff]  ;;  %v118_v4 = vld [vmem:[#allocation5 + $0xf0] sm:$0xff]  ;;  %vm1080_vm0 = vmmov 0   ;;  %s1081_s24 = smov [#allocation10]  }
  0x34   :  { %v151_v1 = vld [vmem:[#allocation5 + $0x1f8] sm:$0xff]  ;;  %712 = vmatprep.subr.mxu0 %v119_v0  ;;  %v150_v5 = vld [vmem:[#allocation5 + $0x1f0] sm:$0xff]  ;;  %v117_v8 = vld [vmem:[#allocation5 + $0xe8] sm:$0xff]  ;;  %s698_s25 = sshll.u32 %s1081_s24, 4  ;;  %s699_s25 = int_to_ptr.vmem [resolvable:$true] %s698_s25 }
  0x35   :  { %v103_v2 = vld [vmem:[#allocation5 + $0x78] sm:$0xff]  ;;  %747 = vmatprep.subr.mxu1 %v151_v1  ;;  %v102_v6 = vld [vmem:[#allocation5 + $0x70] sm:$0xff]  ;;  %v149_v9 = vld [vmem:[#allocation5 + $0x1e8] sm:$0xff]  ;;  %s1045_s26 = scalar_lea.vmem %s699_s25, 128  ;;  %p1050_p7 = scmp.lt.s32.totalorder %s699_s25, %s699_s25 }
  0x36   :  { %v135_v3 = vld [vmem:[#allocation5 + $0x178] sm:$0xff]  ;;  %713 = vmatpush3.msra.mxu0 %v103_v2  ;;  %v134_v7 = vld [vmem:[#allocation5 + $0x170] sm:$0xff]  ;;  %v101_v10 = vld [vmem:[#allocation5 + $0x68] sm:$0xff]  ;;  %p1046_p6 = scmp.ne.s32.totalorder %s699_s25, %s1045_s26  ;;  %p1051_p8 = scmp.lt.s32.totalorder %s1045_s26, %s1045_s26 }
  0x37   :  { %748 = vmatpush3.msra.mxu1 %v135_v3  ;;  %714 = vmatprep.subr.mxu0 %v118_v4  ;;  %v133_v11 = vld [vmem:[#allocation5 + $0x168] sm:$0xff]  ;;  %v116_v12 = vld [vmem:[#allocation5 + $0xe0] sm:$0xff]  ;;  %v115_v16 = vld [vmem:[#allocation5 + $0xd8] sm:$0xff] }
  0x38   :  { %749 = vmatprep.subr.mxu1 %v150_v5  ;;  %715 = vmatpush3.msra.mxu0 %v102_v6  ;;  %v148_v13 = vld [vmem:[#allocation5 + $0x1e0] sm:$0xff]  ;;  %v147_v17 = vld [vmem:[#allocation5 + $0x1d8] sm:$0xff]  ;;  %v114_v20 = vld [vmem:[#allocation5 + $0xd0] sm:$0xff]  ;;  %p1052_p9 = por %p1051_p8, %p1050_p7 }
  0x39   :  { %750 = vmatpush3.msra.mxu1 %v134_v7  ;;  %716 = vmatprep.subr.mxu0 %v117_v8  ;;  %v100_v14 = vld [vmem:[#allocation5 + $0x60] sm:$0xff]  ;;  %v99_v18 = vld [vmem:[#allocation5 + $0x58] sm:$0xff]  ;;  %v146_v21 = vld [vmem:[#allocation5 + $0x1d0] sm:$0xff] }
  0x3a   :  { %751 = vmatprep.subr.mxu1 %v149_v9  ;;  %v132_v15 = vld [vmem:[#allocation5 + $0x160] sm:$0xff]  ;;  %717 = vmatpush3.msra.mxu0 %v101_v10  ;;  %v131_v19 = vld [vmem:[#allocation5 + $0x158] sm:$0xff]  ;;  %v98_v22 = vld [vmem:[#allocation5 + $0x50] sm:$0xff]  ;;  %p1053_p10 = pnand %p1052_p9, %p1046_p6 }
  0x3b   :  { %752 = vmatpush3.msra.mxu1 %v133_v11  ;;  %718 = vmatprep.subr.mxu0 %v116_v12  ;;  %v130_v23 = vld [vmem:[#allocation5 + $0x150] sm:$0xff]  ;;  %v113_v24 = vld [vmem:[#allocation5 + $0xc8] sm:$0xff]  ;;  %v112_v28 = vld [vmem:[#allocation5 + $0xc0] sm:$0xff] }
  0x3c   :  { %753 = vmatprep.subr.mxu1 %v148_v13  ;;  %719 = vmatpush3.msra.mxu0 %v100_v14  ;;  %v145_v25 = vld [vmem:[#allocation5 + $0x1c8] sm:$0xff]  ;;  %v144_v29 = vld [vmem:[#allocation5 + $0x1c0] sm:$0xff]  ;;  %v111_v32 = vld [vmem:[#allocation5 + $0xb8] sm:$0xff] }
  0x3d   :  { %754 = vmatpush3.msra.mxu1 %v132_v15  ;;  %720 = vmatprep.subr.mxu0 %v115_v16  ;;  %v97_v26 = vld [vmem:[#allocation5 + $0x48] sm:$0xff]  ;;  %v96_v30 = vld [vmem:[#allocation5 + $0x40] sm:$0xff]  ;;  %v143_v33 = vld [vmem:[#allocation5 + $0x1b8] sm:$0xff] }
  0x3e   :  { %755 = vmatprep.subr.mxu1 %v147_v17  ;;  %721 = vmatpush3.msra.mxu0 %v99_v18  ;;  %v129_v27 = vld [vmem:[#allocation5 + $0x148] sm:$0xff]  ;;  %v128_v31 = vld [vmem:[#allocation5 + $0x140] sm:$0xff]  ;;  %v95_v34 = vld [vmem:[#allocation5 + $0x38] sm:$0xff] }
  0x3f   :  { %756 = vmatpush3.msra.mxu1 %v131_v19  ;;  %722 = vmatprep.subr.mxu0 %v114_v20  ;;  %v127_v35 = vld [vmem:[#allocation5 + $0x138] sm:$0xff]  ;;  %v110_v36 = vld [vmem:[#allocation5 + $0xb0] sm:$0xff]  ;;  %v109_v40 = vld [vmem:[#allocation5 + $0xa8] sm:$0xff] }
  0x40   :  { %757 = vmatprep.subr.mxu1 %v146_v21  ;;  %723 = vmatpush3.msra.mxu0 %v98_v22  ;;  %v142_v37 = vld [vmem:[#allocation5 + $0x1b0] sm:$0xff]  ;;  %v141_v41 = vld [vmem:[#allocation5 + $0x1a8] sm:$0xff]  ;;  %v108_v44 = vld [vmem:[#allocation5 + $0xa0] sm:$0xff] }
  0x41   :  { %758 = vmatpush3.msra.mxu1 %v130_v23  ;;  %724 = vmatprep.subr.mxu0 %v113_v24  ;;  %v94_v38 = vld [vmem:[#allocation5 + $0x30] sm:$0xff]  ;;  %v93_v42 = vld [vmem:[#allocation5 + $0x28] sm:$0xff]  ;;  %v140_v45 = vld [vmem:[#allocation5 + $0x1a0] sm:$0xff] }
  0x42   :  { %759 = vmatprep.subr.mxu1 %v145_v25  ;;  %725 = vmatpush3.msra.mxu0 %v97_v26  ;;  %v126_v39 = vld [vmem:[#allocation5 + $0x130] sm:$0xff]  ;;  %v125_v43 = vld [vmem:[#allocation5 + $0x128] sm:$0xff]  ;;  %v92_v46 = vld [vmem:[#allocation5 + $0x20] sm:$0xff] }
  0x43   :  { %760 = vmatpush3.msra.mxu1 %v129_v27  ;;  %726 = vmatprep.subr.mxu0 %v112_v28  ;;  %v124_v47 = vld [vmem:[#allocation5 + $0x120] sm:$0xff]  ;;  %v107_v48 = vld [vmem:[#allocation5 + $0x98] sm:$0xff]  ;;  %v106_v52 = vld [vmem:[#allocation5 + $0x90] sm:$0xff] }
  0x44   :  { %761 = vmatprep.subr.mxu1 %v144_v29  ;;  %727 = vmatpush3.msra.mxu0 %v96_v30  ;;  %v139_v49 = vld [vmem:[#allocation5 + $0x198] sm:$0xff]  ;;  %v138_v53 = vld [vmem:[#allocation5 + $0x190] sm:$0xff]  ;;  %v105_v56 = vld [vmem:[#allocation5 + $0x88] sm:$0xff] }
  0x45   :  { %762 = vmatpush3.msra.mxu1 %v128_v31  ;;  %728 = vmatprep.subr.mxu0 %v111_v32  ;;  %v91_v50 = vld [vmem:[#allocation5 + $0x18] sm:$0xff]  ;;  %v90_v54 = vld [vmem:[#allocation5 + $0x10] sm:$0xff]  ;;  %v137_v57 = vld [vmem:[#allocation5 + $0x188] sm:$0xff] }
  0x46   :  { %763 = vmatprep.subr.mxu1 %v143_v33  ;;  %729 = vmatpush3.msra.mxu0 %v95_v34  ;;  %v123_v51 = vld [vmem:[#allocation5 + $0x118] sm:$0xff]  ;;  %v122_v55 = vld [vmem:[#allocation5 + $0x110] sm:$0xff]  ;;  %v89_v58 = vld [vmem:[#allocation5 + $0x8] sm:$0xff] }
  0x47   :  { %764 = vmatpush3.msra.mxu1 %v127_v35  ;;  %730 = vmatprep.subr.mxu0 %v110_v36  ;;  %v121_v59 = vld [vmem:[#allocation5 + $0x108] sm:$0xff]  ;;  %v104_v60 = vld [vmem:[#allocation5 + $0x80] sm:$0xff]  ;;  %v83_v2 = vld [vmem:[#allocation2 + $0x18] sm:$0xff] }
  0x48   :  { %765 = vmatprep.subr.mxu1 %v142_v37  ;;  %731 = vmatpush3.msra.mxu0 %v94_v38  ;;  %v136_v61 = vld [vmem:[#allocation5 + $0x180] sm:$0xff]  ;;  %v81_v63 = vld [vmem:[#allocation2 + $0x8] sm:$0xff]  ;;  %v183_v3 = vld [vmem:[#allocation5 + $0x2f8] sm:$0xff] }
  0x49   :  { %766 = vmatpush3.msra.mxu1 %v126_v39  ;;  %732 = vmatprep.subr.mxu0 %v109_v40  ;;  %v88_v62 = vld [vmem:[#allocation5] sm:$0xff]  ;;  %v215_v4 = vld [vmem:[#allocation5 + $0x3f8] sm:$0xff]  ;;  %v82_v5 = vld [vmem:[#allocation2 + $0x10] sm:$0xff] }
  0x4a   :  { %767 = vmatprep.subr.mxu1 %v141_v41  ;;  %733 = vmatpush3.msra.mxu0 %v93_v42  ;;  %v120_v0 = vld [vmem:[#allocation5 + $0x100] sm:$0xff]  ;;  %v167_v6 = vld [vmem:[#allocation5 + $0x278] sm:$0xff]  ;;  %v182_v8 = vld [vmem:[#allocation5 + $0x2f0] sm:$0xff] }
  0x4b   :  { %768 = vmatpush3.msra.mxu1 %v125_v43  ;;  %734 = vmatprep.subr.mxu0 %v108_v44  ;;  %v80_v1 = vld [vmem:[#allocation2] sm:$0xff]  ;;  %v199_v7 = vld [vmem:[#allocation5 + $0x378] sm:$0xff]  ;;  %v214_v9 = vld [vmem:[#allocation5 + $0x3f0] sm:$0xff] }
  0x4c   :  { %769 = vmatprep.subr.mxu1 %v140_v45  ;;  %735 = vmatpush3.msra.mxu0 %v92_v46  ;;  %v166_v10 = vld [vmem:[#allocation5 + $0x270] sm:$0xff]  ;;  %v181_v12 = vld [vmem:[#allocation5 + $0x2e8] sm:$0xff]  ;;  %v180_v16 = vld [vmem:[#allocation5 + $0x2e0] sm:$0xff] }
  0x4d   :  { %770 = vmatpush3.msra.mxu1 %v124_v47  ;;  %736 = vmatprep.subr.mxu0 %v107_v48  ;;  %v198_v11 = vld [vmem:[#allocation5 + $0x370] sm:$0xff]  ;;  %v213_v13 = vld [vmem:[#allocation5 + $0x3e8] sm:$0xff]  ;;  %v212_v17 = vld [vmem:[#allocation5 + $0x3e0] sm:$0xff] }
  0x4e   :  { %771 = vmatprep.subr.mxu1 %v139_v49  ;;  %737 = vmatpush3.msra.mxu0 %v91_v50  ;;  %v165_v14 = vld [vmem:[#allocation5 + $0x268] sm:$0xff]  ;;  %v164_v18 = vld [vmem:[#allocation5 + $0x260] sm:$0xff]  ;;  %v179_v20 = vld [vmem:[#allocation5 + $0x2d8] sm:$0xff] }
  0x4f   :  { %772 = vmatpush3.msra.mxu1 %v123_v51  ;;  %738 = vmatprep.subr.mxu0 %v106_v52  ;;  %v197_v15 = vld [vmem:[#allocation5 + $0x368] sm:$0xff]  ;;  %v196_v19 = vld [vmem:[#allocation5 + $0x360] sm:$0xff]  ;;  %v211_v21 = vld [vmem:[#allocation5 + $0x3d8] sm:$0xff] }
  0x50   :  { %773 = vmatprep.subr.mxu1 %v138_v53  ;;  %739 = vmatpush3.msra.mxu0 %v90_v54  ;;  %v163_v22 = vld [vmem:[#allocation5 + $0x258] sm:$0xff]  ;;  %v178_v24 = vld [vmem:[#allocation5 + $0x2d0] sm:$0xff]  ;;  %v177_v28 = vld [vmem:[#allocation5 + $0x2c8] sm:$0xff] }
  0x51   :  { %774 = vmatpush3.msra.mxu1 %v122_v55  ;;  %740 = vmatprep.subr.mxu0 %v105_v56  ;;  %v195_v23 = vld [vmem:[#allocation5 + $0x358] sm:$0xff]  ;;  %v210_v25 = vld [vmem:[#allocation5 + $0x3d0] sm:$0xff]  ;;  %v209_v29 = vld [vmem:[#allocation5 + $0x3c8] sm:$0xff] }
  0x52   :  { %775 = vmatprep.subr.mxu1 %v137_v57  ;;  %741 = vmatpush3.msra.mxu0 %v89_v58  ;;  %v162_v26 = vld [vmem:[#allocation5 + $0x250] sm:$0xff]  ;;  %v161_v30 = vld [vmem:[#allocation5 + $0x248] sm:$0xff]  ;;  %v176_v32 = vld [vmem:[#allocation5 + $0x2c0] sm:$0xff] }
  0x53   :  { %776 = vmatpush3.msra.mxu1 %v121_v59  ;;  %742 = vmatprep.subr.mxu0 %v104_v60  ;;  %v194_v27 = vld [vmem:[#allocation5 + $0x350] sm:$0xff]  ;;  %v193_v31 = vld [vmem:[#allocation5 + $0x348] sm:$0xff]  ;;  %v208_v33 = vld [vmem:[#allocation5 + $0x3c0] sm:$0xff] }
  0x54   :  { %777 = vmatprep.subr.mxu1 %v136_v61  ;;  %743 = vmatpush3.msra.mxu0 %v88_v62  ;;  %v160_v34 = vld [vmem:[#allocation5 + $0x240] sm:$0xff]  ;;  %v175_v36 = vld [vmem:[#allocation5 + $0x2b8] sm:$0xff]  ;;  %v174_v40 = vld [vmem:[#allocation5 + $0x2b0] sm:$0xff] }
  0x55   :  { %287 = vmatprep.mubr.f32.mxu0 %v81_v63  ;;  %778 = vmatpush3.msra.mxu1 %v120_v0  ;;  %v192_v35 = vld [vmem:[#allocation5 + $0x340] sm:$0xff]  ;;  %v207_v37 = vld [vmem:[#allocation5 + $0x3b8] sm:$0xff]  ;;  %v206_v41 = vld [vmem:[#allocation5 + $0x3b0] sm:$0xff] }
  0x56   :  { %288 = vmatmul.mubr.f32.vlgmr.msra.gmra.mxu0 %v80_v1  ;;  %357 = vmatprep.mubr.f32.mxu1 %v83_v2  ;;  %v159_v38 = vld [vmem:[#allocation5 + $0x238] sm:$0xff]  ;;  %v158_v42 = vld [vmem:[#allocation5 + $0x230] sm:$0xff]  ;;  %v173_v44 = vld [vmem:[#allocation5 + $0x2a8] sm:$0xff] }
  0x57   :  { %782 = vmatprep.subr.mxu0 %v183_v3  ;;  %817 = vmatprep.subr.mxu1 %v215_v4  ;;  %v191_v39 = vld [vmem:[#allocation5 + $0x338] sm:$0xff]  ;;  %v190_v43 = vld [vmem:[#allocation5 + $0x330] sm:$0xff]  ;;  %v205_v45 = vld [vmem:[#allocation5 + $0x3a8] sm:$0xff] }
  0x58   :  { %358 = vmatmul.mubr.f32.vlgmr.msra.gmra.mxu1 %v82_v5  ;;  %783 = vmatpush3.msra.mxu0 %v167_v6  ;;  %v157_v46 = vld [vmem:[#allocation5 + $0x228] sm:$0xff]  ;;  %v172_v48 = vld [vmem:[#allocation5 + $0x2a0] sm:$0xff]  ;;  %v171_v52 = vld [vmem:[#allocation5 + $0x298] sm:$0xff] }
  0x59   :  { %818 = vmatpush3.msra.mxu1 %v199_v7  ;;  %784 = vmatprep.subr.mxu0 %v182_v8  ;;  %v189_v47 = vld [vmem:[#allocation5 + $0x328] sm:$0xff]  ;;  %v204_v49 = vld [vmem:[#allocation5 + $0x3a0] sm:$0xff]  ;;  %v203_v53 = vld [vmem:[#allocation5 + $0x398] sm:$0xff] }
  0x5a   :  { %819 = vmatprep.subr.mxu1 %v214_v9  ;;  %785 = vmatpush3.msra.mxu0 %v166_v10  ;;  %v156_v50 = vld [vmem:[#allocation5 + $0x220] sm:$0xff]  ;;  %v155_v54 = vld [vmem:[#allocation5 + $0x218] sm:$0xff]  ;;  %v170_v56 = vld [vmem:[#allocation5 + $0x290] sm:$0xff]  ;;  %v1079_v9 = vmov 0.0  }
  0x5b   :  { %820 = vmatpush3.msra.mxu1 %v198_v11  ;;  %786 = vmatprep.subr.mxu0 %v181_v12  ;;  %v188_v51 = vld [vmem:[#allocation5 + $0x320] sm:$0xff]  ;;  %v187_v55 = vld [vmem:[#allocation5 + $0x318] sm:$0xff]  ;;  %v202_v57 = vld [vmem:[#allocation5 + $0x390] sm:$0xff] }
  0x5c   :  { %821 = vmatprep.subr.mxu1 %v213_v13  ;;  %787 = vmatpush3.msra.mxu0 %v165_v14  ;;  %v154_v58 = vld [vmem:[#allocation5 + $0x210] sm:$0xff]  ;;  %v169_v60 = vld [vmem:[#allocation5 + $0x288] sm:$0xff]  ;;  %v168_v0 = vld [vmem:[#allocation5 + $0x280] sm:$0xff] }
  0x5d   :  { %822 = vmatpush3.msra.mxu1 %v197_v15  ;;  %788 = vmatprep.subr.mxu0 %v180_v16  ;;  %v186_v59 = vld [vmem:[#allocation5 + $0x310] sm:$0xff]  ;;  %v201_v61 = vld [vmem:[#allocation5 + $0x388] sm:$0xff]  ;;  %v200_v1 = vld [vmem:[#allocation5 + $0x380] sm:$0xff] }
  0x5e   :  { %823 = vmatprep.subr.mxu1 %v212_v17  ;;  %789 = vmatpush3.msra.mxu0 %v164_v18  ;;  %v153_v62 = vld [vmem:[#allocation5 + $0x208] sm:$0xff]  ;;  %v152_v2 = vld [vmem:[#allocation5 + $0x200] sm:$0xff]  ;;  %v87_v5 = vld [vmem:[#allocation2 + $0x38] sm:$0xff] }
  0x5f   :  { %824 = vmatpush3.msra.mxu1 %v196_v19  ;;  %790 = vmatprep.subr.mxu0 %v179_v20  ;;  %v185_v63 = vld [vmem:[#allocation5 + $0x308] sm:$0xff]  ;;  %v184_v4 = vld [vmem:[#allocation5 + $0x300] sm:$0xff]  ;;  %v86_v7 = vld [vmem:[#allocation2 + $0x30] sm:$0xff] }
  0x60   :  { %825 = vmatprep.subr.mxu1 %v211_v21  ;;  %791 = vmatpush3.msra.mxu0 %v163_v22  ;;  %v85_v3 = vld [vmem:[#allocation2 + $0x28] sm:$0xff]  ;;  %v84_v6 = vld [vmem:[#allocation2 + $0x20] sm:$0xff]  ;;  %v519_v8 = vld [vmem:[#allocation7 + $0x78] sm:$0xff] }
  0x61   :  { %826 = vmatpush3.msra.mxu1 %v195_v23  ;;  %792 = vmatprep.subr.mxu0 %v178_v24  ;;  %v518_v10 = vld [vmem:[#allocation7 + $0x70] sm:$0xff]  ;;  %v517_v11 = vld [vmem:[#allocation7 + $0x68] sm:$0xff]  ;;  %v516_v12 = vld [vmem:[#allocation7 + $0x60] sm:$0xff] }
  0x62   :  { %827 = vmatprep.subr.mxu1 %v210_v25  ;;  %793 = vmatpush3.msra.mxu0 %v162_v26  ;;  %v515_v13 = vld [vmem:[#allocation7 + $0x58] sm:$0xff]  ;;  %v514_v14 = vld [vmem:[#allocation7 + $0x50] sm:$0xff]  ;;  %v513_v15 = vld [vmem:[#allocation7 + $0x48] sm:$0xff] }
  0x63   :  { %828 = vmatpush3.msra.mxu1 %v194_v27  ;;  %794 = vmatprep.subr.mxu0 %v177_v28  ;;  %v512_v16 = vld [vmem:[#allocation7 + $0x40] sm:$0xff]  ;;  %v511_v17 = vld [vmem:[#allocation7 + $0x38] sm:$0xff]  ;;  %v510_v18 = vld [vmem:[#allocation7 + $0x30] sm:$0xff] }
  0x64   :  { %829 = vmatprep.subr.mxu1 %v209_v29  ;;  %795 = vmatpush3.msra.mxu0 %v161_v30  ;;  %v509_v19 = vld [vmem:[#allocation7 + $0x28] sm:$0xff]  ;;  %v508_v20 = vld [vmem:[#allocation7 + $0x20] sm:$0xff]  ;;  %v507_v21 = vld [vmem:[#allocation7 + $0x18] sm:$0xff] }
  0x65   :  { %830 = vmatpush3.msra.mxu1 %v193_v31  ;;  %796 = vmatprep.subr.mxu0 %v176_v32  ;;  %v506_v22 = vld [vmem:[#allocation7 + $0x10] sm:$0xff]  ;;  %v505_v23 = vld [vmem:[#allocation7 + $0x8] sm:$0xff]  ;;  %v504_v24 = vld [vmem:[#allocation7] sm:$0xff] }
  0x66   :  { %831 = vmatprep.subr.mxu1 %v208_v33  ;;  %797 = vmatpush3.msra.mxu0 %v160_v34  ;;  %v613_v25 = vld [vmem:[#allocation8 + $0x78] sm:$0xff]  ;;  %v612_v26 = vld [vmem:[#allocation8 + $0x70] sm:$0xff]  ;;  %v611_v27 = vld [vmem:[#allocation8 + $0x68] sm:$0xff] }
  0x67   :  { %832 = vmatpush3.msra.mxu1 %v192_v35  ;;  %798 = vmatprep.subr.mxu0 %v175_v36  ;;  %v610_v28 = vld [vmem:[#allocation8 + $0x60] sm:$0xff]  ;;  %v609_v29 = vld [vmem:[#allocation8 + $0x58] sm:$0xff]  ;;  %v608_v30 = vld [vmem:[#allocation8 + $0x50] sm:$0xff] }
  0x68   :  { %833 = vmatprep.subr.mxu1 %v207_v37  ;;  %799 = vmatpush3.msra.mxu0 %v159_v38  ;;  %v607_v31 = vld [vmem:[#allocation8 + $0x48] sm:$0xff]  ;;  %v606_v32 = vld [vmem:[#allocation8 + $0x40] sm:$0xff]  ;;  %v605_v33 = vld [vmem:[#allocation8 + $0x38] sm:$0xff] }
  0x69   :  { %834 = vmatpush3.msra.mxu1 %v191_v39  ;;  %800 = vmatprep.subr.mxu0 %v174_v40  ;;  %v604_v34 = vld [vmem:[#allocation8 + $0x30] sm:$0xff]  ;;  %v603_v35 = vld [vmem:[#allocation8 + $0x28] sm:$0xff]  ;;  %v602_v36 = vld [vmem:[#allocation8 + $0x20] sm:$0xff] }
  0x6a   :  { %835 = vmatprep.subr.mxu1 %v206_v41  ;;  %801 = vmatpush3.msra.mxu0 %v158_v42  ;;  %v601_v37 = vld [vmem:[#allocation8 + $0x18] sm:$0xff]  ;;  %v709_v42 = vld [vmem:[%s1191_s2] ss:$0 sm:$0xff] }
  0x6b   :  { %836 = vmatpush3.msra.mxu1 %v190_v43  ;;  %802 = vmatprep.subr.mxu0 %v173_v44 }
  0x6c   :  { %837 = vmatprep.subr.mxu1 %v205_v45  ;;  %803 = vmatpush3.msra.mxu0 %v157_v46 }
  0x6d   :  { %838 = vmatpush3.msra.mxu1 %v189_v47  ;;  %804 = vmatprep.subr.mxu0 %v172_v48 }
  0x6e   :  { %839 = vmatprep.subr.mxu1 %v204_v49  ;;  %805 = vmatpush3.msra.mxu0 %v156_v50 }
  0x6f   :  { %840 = vmatpush3.msra.mxu1 %v188_v51  ;;  %806 = vmatprep.subr.mxu0 %v171_v52 }
  0x70   :  { %841 = vmatprep.subr.mxu1 %v203_v53  ;;  %807 = vmatpush3.msra.mxu0 %v155_v54 }
  0x71   :  { %842 = vmatpush3.msra.mxu1 %v187_v55  ;;  %808 = vmatprep.subr.mxu0 %v170_v56  ;;  %v600_v56 = vld [vmem:[#allocation8 + $0x10] sm:$0xff] }
  0x72   :  { %843 = vmatprep.subr.mxu1 %v202_v57  ;;  %809 = vmatpush3.msra.mxu0 %v154_v58  ;;  %v599_v57 = vld [vmem:[#allocation8 + $0x8] sm:$0xff]  ;;  %v598_v58 = vld [vmem:[#allocation8] sm:$0xff] }
  0x73   :  { %844 = vmatpush3.msra.mxu1 %v186_v59  ;;  %810 = vmatprep.subr.mxu0 %v169_v60  ;;  %v710_v59 = vld [vmem:[%s1193_s4] ss:$0 sm:$0xff] }
  0x74   :  { %845 = vmatprep.subr.mxu1 %v201_v61  ;;  %811 = vmatpush3.msra.mxu0 %v153_v62 }
  0x75   :  { %846 = vmatpush3.msra.mxu1 %v185_v63  ;;  %812 = vmatprep.subr.mxu0 %v168_v0  ;;  %v711_v0 = vld [vmem:[%s1195_s6] ss:$0 sm:$0xff] }
  0x76   :  { %847 = vmatprep.subr.mxu1 %v200_v1  ;;  %813 = vmatpush3.msra.mxu0 %v152_v2 }
  0x77   :  { %427 = vmatprep.mubr.f32.mxu0 %v85_v3  ;;  %848 = vmatpush3.msra.mxu1 %v184_v4 }
  0x78   :  { %497 = vmatprep.mubr.f32.mxu1 %v87_v5  ;;  %428 = vmatmul.mubr.f32.vlgmr.msra.gmra.mxu0 %v84_v6 }
  0x79   :  { %498 = vmatmul.mubr.f32.vlgmr.msra.gmra.mxu1 %v86_v7  ;;  %886 = vmatprep.subr.mxu0 %v1079_v9 }
  0x7a   :  { %921 = vmatprep.subr.mxu1 %v1079_v9  ;;  %887 = vmatpush3.msra.mxu0 %v519_v8 }
  0x7b   :  { %888 = vmatprep.subr.mxu0 %v1079_v9  ;;  %918 = vmatprep.mubr.msk.f32.mxu0 %vm1080_vm0, %v1079_v9 }
  0x7c   :  { %889 = vmatpush3.msra.mxu0 %v518_v10  ;;  %953 = vmatprep.mubr.msk.f32.mxu1 %vm1080_vm0, %v1079_v9 }
  0x7d   :  { %890 = vmatprep.subr.mxu0 %v1079_v9  ;;  %922 = vmatpush3.msra.mxu1 %v613_v25 }
  0x7e   :  { %891 = vmatpush3.msra.mxu0 %v517_v11  ;;  %923 = vmatprep.subr.mxu1 %v1079_v9 }
  0x7f   :  { %892 = vmatprep.subr.mxu0 %v1079_v9  ;;  %924 = vmatpush3.msra.mxu1 %v612_v26 }
  0x80   :  { %893 = vmatpush3.msra.mxu0 %v516_v12  ;;  %925 = vmatprep.subr.mxu1 %v1079_v9 }
  0x81   :  { %894 = vmatprep.subr.mxu0 %v1079_v9  ;;  %926 = vmatpush3.msra.mxu1 %v611_v27 }
  0x82   :  { %895 = vmatpush3.msra.mxu0 %v515_v13  ;;  %927 = vmatprep.subr.mxu1 %v1079_v9 }
  0x83   :  { %896 = vmatprep.subr.mxu0 %v1079_v9  ;;  %928 = vmatpush3.msra.mxu1 %v610_v28 }
  0x84   :  { %897 = vmatpush3.msra.mxu0 %v514_v14  ;;  %929 = vmatprep.subr.mxu1 %v1079_v9 }
  0x85   :  { %898 = vmatprep.subr.mxu0 %v1079_v9  ;;  %930 = vmatpush3.msra.mxu1 %v609_v29 }
  0x86   :  { %899 = vmatpush3.msra.mxu0 %v513_v15  ;;  %931 = vmatprep.subr.mxu1 %v1079_v9 }
  0x87   :  { %900 = vmatprep.subr.mxu0 %v1079_v9  ;;  %932 = vmatpush3.msra.mxu1 %v608_v30 }
  0x88   :  { %901 = vmatpush3.msra.mxu0 %v512_v16  ;;  %933 = vmatprep.subr.mxu1 %v1079_v9 }
  0x89   :  { %902 = vmatprep.subr.mxu0 %v1079_v9  ;;  %934 = vmatpush3.msra.mxu1 %v607_v31 }
  0x8a   :  { %903 = vmatpush3.msra.mxu0 %v511_v17  ;;  %935 = vmatprep.subr.mxu1 %v1079_v9 }
  0x8b   :  { %904 = vmatprep.subr.mxu0 %v1079_v9  ;;  %936 = vmatpush3.msra.mxu1 %v606_v32 }
  0x8c   :  { %905 = vmatpush3.msra.mxu0 %v510_v18  ;;  %937 = vmatprep.subr.mxu1 %v1079_v9 }
  0x8d   :  { %906 = vmatprep.subr.mxu0 %v1079_v9  ;;  %938 = vmatpush3.msra.mxu1 %v605_v33 }
  0x8e   :  { %907 = vmatpush3.msra.mxu0 %v509_v19  ;;  %939 = vmatprep.subr.mxu1 %v1079_v9 }
  0x8f   :  { %908 = vmatprep.subr.mxu0 %v1079_v9  ;;  %940 = vmatpush3.msra.mxu1 %v604_v34 }
  0x90   :  { %909 = vmatpush3.msra.mxu0 %v508_v20  ;;  %941 = vmatprep.subr.mxu1 %v1079_v9 }
  0x91   :  { %910 = vmatprep.subr.mxu0 %v1079_v9  ;;  %942 = vmatpush3.msra.mxu1 %v603_v35 }
  0x92   :  { %911 = vmatpush3.msra.mxu0 %v507_v21  ;;  %943 = vmatprep.subr.mxu1 %v1079_v9 }
  0x93   :  { %912 = vmatprep.subr.mxu0 %v1079_v9  ;;  %944 = vmatpush3.msra.mxu1 %v602_v36 }
  0x94   :  { %913 = vmatpush3.msra.mxu0 %v506_v22  ;;  %945 = vmatprep.subr.mxu1 %v1079_v9 }
  0x95   :  { %914 = vmatprep.subr.mxu0 %v1079_v9  ;;  %946 = vmatpush3.msra.mxu1 %v601_v37 }
  0x96   :  { %915 = vmatpush3.msra.mxu0 %v505_v23  ;;  %947 = vmatprep.subr.mxu1 %v1079_v9 }
  0x97   :  { %916 = vmatprep.subr.mxu0 %v1079_v9  ;;  %948 = vmatpush3.msra.mxu1 %v600_v56 }
  0x98   :  { %917 = vmatpush3.msra.mxu0 %v504_v24  ;;  %949 = vmatprep.subr.mxu1 %v1079_v9 }
  0x99   :  { %950 = vmatpush3.msra.mxu1 %v599_v57 }
  0x9a   :  { %951 = vmatprep.subr.mxu1 %v1079_v9 }
  0x9b   :  { %952 = vmatpush3.msra.mxu1 %v598_v58 }
 0x116   :  { %v744_v38 = vpop.f32.mrf.mxu0 }
 0x118   :  { %v779_v39 = vpop.f32.mrf.mxu1  ;;  %v745_v40 = vpop.f32.mrf.mxu0 }
 0x119   :  { %v746_v41 = vadd.f32 %v745_v40, %v744_v38 }
 0x11a   :  { %v780_v43 = vpop.f32.mrf.mxu1 }
 0x11b   :  { %v290_v44 = vadd.f32 %v746_v41, %v709_v42  ;;  %v781_v45 = vadd.f32 %v780_v43, %v779_v39 }
 0x11d   :  { %v360_v50 = vadd.f32 %v781_v45, %v290_v44 }
 0x138   :  { %v814_v46 = vpop.f32.mrf.mxu0 }
 0x139   :  { %v849_v47 = vpop.f32.mrf.mxu1 }
 0x13a   :  { %v815_v48 = vpop.f32.mrf.mxu0 }
 0x13b   :  { %v850_v49 = vpop.f32.mrf.mxu1  ;;  %v816_v51 = vadd.f32 %v815_v48, %v814_v46 }
 0x13c   :  { %v851_v53 = vadd.f32 %v850_v49, %v849_v47 }
 0x13d   :  { %v430_v52 = vadd.f32 %v816_v51, %v360_v50 }
 0x13f   :  { %v500_v54 = vadd.f32 %v851_v53, %v430_v52 }
 0x141   :  { %v503_v55 = vmax.f32 %v500_v54, 0.0 }
 0x143   :  { %919 = vmatmul.mubr.f32.vlgmr.msra.gmra.mxu0 %v503_v55 }
 0x203   :  { %v593_v60 = vpop.f32.mrf.mxu0 }
 0x204   :  { %v594_v61 = vadd.f32 %v710_v59, %v593_v60 }
 0x205   :  { %v920_v62 = vpop.f32.mrf.mxu0 }
 0x206   :  { %v597_v63 = vmax.f32 %v594_v61, 0.0 }
 0x208   :  { %954 = vmatmul.mubr.f32.vlgmr.msra.gmra.mxu1 %v597_v63 }
 0x2c8   :  { %v687_v1 = vpop.f32.mrf.mxu1 }
 0x2c9   :  { %v688_v2 = vadd.f32 %v711_v0, %v687_v1 }
 0x2ca   :  { %v955_v3 = vpop.f32.mrf.mxu1 }
 0x2cb   :  { %691 = vst [vmem:[#allocation10] sm:$0xff] %v688_v2 }
 0x2cc   :  { %1056 = shalt.err (!%p1053_p10)
}
 0x2cd   :  { %701 = dma.vmem_to_hbm [thread:$0]  %s699_s25, 128, %s1196_s7, [#allocation4]  }
 0x2ce   :  { %1071 = dma.done.wait [#allocation4], 128  }
 0x2cf   :  { %1072 = vsyncadd [#allocation4], 4294967168 }
 0x2d0   :  { %705 = vsyncpa [#allocation3], 1 }
 0x2d1   :  { %706 = vsyncpa [#allocation6], 1 }
 0x2d2   :  { %707 = vsyncpa [#allocation9], 1 }
 0x2d3   :  { %708 = vsyncpa [#allocation4], 1 }

</bundles_post_ra>
